<compile_context>
chip_gen: v7x
topology: tpu7x:2x2x1
jax: 0.10.0
libtpu: 0.0.40
codegen_flags: <defaults>
</compile_context>

<pallas_src>
import functools

import jax
import jax.numpy as jnp
from jax.experimental import pallas as pl
from jax.experimental.pallas import tpu as pltpu

# ----------------------------- test configuration ----------------------------
# Matches To_BCHW(resolution=(H, W)) applied to a (B, H*W, C) token tensor.
B = 2
H, W = 8, 16
C = 32
L = H * W                      # 128 tokens -> exactly one lane width

# Conservative per-step VMEM budget (default scoped limit is 32 MiB; leave
# headroom for double-buffered input + output blocks).
_VMEM_BUDGET_BYTES = 24 * 1024 * 1024


# ------------------------------- Pallas kernels -------------------------------
def _transpose_kernel(x_ref, o_ref):
    # x_ref: (B, L_blk, C) block; o_ref: (B, C, L_blk) block.
    # (L, C) -> (C, L) transpose rides the XLU slot; last dim L_blk (multiple
    # of 128 on the tiled path, or the full L=128 here) keeps stores lane-dense.
    o_ref[...] = jnp.transpose(x_ref[...], (0, 2, 1))


def _pick_l_tile(batch, tokens, channels, itemsize, budget):
    """Largest multiple of 128 dividing `tokens` whose blocks fit `budget`."""
    best = 128
    t = 128
    while t <= tokens:
        # input block + output block, each double-buffered.
        resident = 4 * batch * channels * t * itemsize
        if tokens % t == 0 and resident <= budget:
            best = t
        t += 128
    return best


@functools.lru_cache(maxsize=None)
def _build_to_bchw_call(batch, tokens, channels, dtype_name):
    dtype = jnp.dtype(dtype_name)
    itemsize = dtype.itemsize
    cost = pl.CostEstimate(
        flops=0,
        transcendentals=0,
        bytes_accessed=2 * batch * tokens * channels * itemsize,
    )
    out_shape = jax.ShapeDtypeStruct((batch, channels, tokens), dtype)

    # Whole-slab residency: input + output, each double-buffered.
    whole_resident = 4 * batch * tokens * channels * itemsize
    if whole_resident <= _VMEM_BUDGET_BYTES or tokens % 128 != 0:
        # Single grid step, whole-array blocks: one contiguous DMA in, one out.
        return pl.pallas_call(
            _transpose_kernel,
            out_shape=out_shape,
            in_specs=[pl.BlockSpec((batch, tokens, channels), lambda: (0, 0, 0))],
            out_specs=pl.BlockSpec((batch, channels, tokens), lambda: (0, 0, 0)),
            cost_estimate=cost,
        )

    # Large-shape path: tile the token axis (lane-dense multiples of 128) and
    # let BlockSpec pipelining double-buffer the chunks.
    l_tile = _pick_l_tile(batch, tokens, channels, itemsize, _VMEM_BUDGET_BYTES)
    return pl.pallas_call(
        _transpose_kernel,
        out_shape=out_shape,
        grid=(tokens // l_tile,),
        in_specs=[pl.BlockSpec((batch, l_tile, channels), lambda l: (0, l, 0))],
        out_specs=pl.BlockSpec((batch, channels, l_tile), lambda l: (0, 0, l)),
        compiler_params=pltpu.CompilerParams(
            dimension_semantics=("arbitrary",),
        ),
        cost_estimate=cost,
    )


def to_bchw_forward(x, resolution):
    """x: (B, H*W, C) -> (B, C, H, W), matching To_BCHW.forward (dtype-generic)."""
    b, l, c = x.shape
    h, w = resolution
    assert l == h * w, (l, h, w)
    call = _build_to_bchw_call(b, l, c, jnp.dtype(x.dtype).name)
    y = call(x)                       # (B, C, L): lane-dense kernel output
    return y.reshape(b, c, h, w)      # contiguous view, free


# ------------------------------ pure-JAX reference ---------------------------
def reference_forward(x, resolution):
    b, l, c = x.shape
    h, w = resolution
    # Faithful replication of the PyTorch body, including the no-op round trip:
    #   transpose -> view(B,C,H,W) -> view(B,C,-1) -> transpose -> transpose
    #   -> view(B,C,H,W)
    y = jnp.transpose(x, (0, 2, 1)).reshape(b, c, h, w)
    y = jnp.transpose(y.reshape(b, c, l), (0, 2, 1))
    y = jnp.transpose(y, (0, 2, 1)).reshape(b, c, h, w)
    return y


# ------------------------------------ main -----------------------------------
if __name__ == "__main__":
    key = jax.random.PRNGKey(0)
    x = jax.random.normal(key, (B, L, C), jnp.float32)

    fwd = jax.jit(functools.partial(to_bchw_forward, resolution=(H, W)))
    out = jax.block_until_ready(fwd(x))

    ref = reference_forward(x, (H, W))
    assert out.shape == (B, C, H, W), out.shape
    err = float(jnp.max(jnp.abs(out - ref)))
    assert jnp.allclose(out, ref, atol=0.0, rtol=0.0), f"max abs err = {err}"

    # Also exercise the dtype-generic (bf16) path — the op is memory-bound, so
    # running in the model's activation dtype halves HBM bytes moved.
    x_bf16 = x.astype(jnp.bfloat16)
    out_bf16 = jax.block_until_ready(
        jax.jit(functools.partial(to_bchw_forward, resolution=(H, W)))(x_bf16))
    ref_bf16 = reference_forward(x_bf16, (H, W))
    assert out_bf16.dtype == jnp.bfloat16
    assert jnp.array_equal(out_bf16, ref_bf16)

    print("KERNEL_OK")
</pallas_src>

<mosaic_0001>
module attributes {stable_mosaic.version = 11 : i64} {
  func.func @_transpose_kernel(%arg0: memref<2x128x32xf32, #tpu.memory_space<vmem>>, %arg1: memref<2x32x128xf32, #tpu.memory_space<vmem>>) attributes {dimension_semantics = [], scalar_prefetch = 0 : i64, scratch_operands = 0 : i64, tpu.core_type = #tpu.core_type<tc>} {
    %c0 = arith.constant 0 : index
    %c0_0 = arith.constant 0 : index
    %c0_1 = arith.constant 0 : index
    %0 = vector.load %arg0[%c0, %c0_0, %c0_1] : memref<2x128x32xf32, #tpu.memory_space<vmem>>, vector<2x128x32xf32>
    %1 = tpu.transpose %0, [0, 2, 1] : vector<2x128x32xf32> -> vector<2x32x128xf32>
    %c0_2 = arith.constant 0 : index
    %c0_3 = arith.constant 0 : index
    %c0_4 = arith.constant 0 : index
    %2 = vector.load %arg1[%c0_2, %c0_3, %c0_4] : memref<2x32x128xf32, #tpu.memory_space<vmem>>, vector<2x32x128xf32>
    tpu.vector_store %arg1[%c0_2, %c0_3, %c0_4], %1 {strides = array<i32>} : memref<2x32x128xf32, #tpu.memory_space<vmem>>, vector<2x32x128xf32>,
    return
  }
}

</mosaic_0001>

<bundles_post_ra>
// kernel: to_bchw_forward.1
= control target key start
LH: loop header
LB: loop body
LE: loop exit
PB: predicated region body
PF: predicated region fallthrough
CT: control target
= control target key end

     0   :  { %s246_s0 = inlined_call_operand.vmem [shape: f32[2,128,32], index: 0, kind: input, shape index: {}]   ;;  %s247_s1 = inlined_call_operand.vmem [shape: f32[2,32,128], index: 1, kind: output, shape index: {}]  }
   0x1   :  { %v24_v0 = vld [vmem:[%s246_s0 + $0x80] sm:$0xff]  ;;  %v25_v2 = vld [vmem:[%s246_s0 + $0x88] sm:$0xff]  ;;  %v26_v4 = vld [vmem:[%s246_s0 + $0x90] sm:$0xff] }
   0x2   :  { %v8_v1 = vld [vmem:[%s246_s0] sm:$0xff]  ;;  %72 = vxpose.xlu1.b32.start [1/16] (narrow) %v24_v0, 32  ;;  %v9_v3 = vld [vmem:[%s246_s0 + $0x8] sm:$0xff]  ;;  %v10_v5 = vld [vmem:[%s246_s0 + $0x10] sm:$0xff] }
   0x3   :  { %40 = vxpose.xlu0.b32.start [1/16] (narrow) %v8_v1, 32  ;;  %v27_v6 = vld [vmem:[%s246_s0 + $0x98] sm:$0xff]  ;;  %v28_v8 = vld [vmem:[%s246_s0 + $0xa0] sm:$0xff]  ;;  %v29_v10 = vld [vmem:[%s246_s0 + $0xa8] sm:$0xff] }
   0x4   :  { %v11_v7 = vld [vmem:[%s246_s0 + $0x18] sm:$0xff]  ;;  %v12_v9 = vld [vmem:[%s246_s0 + $0x20] sm:$0xff]  ;;  %v13_v11 = vld [vmem:[%s246_s0 + $0x28] sm:$0xff] }
   0x5   :  { %v30_v12 = vld [vmem:[%s246_s0 + $0xb0] sm:$0xff]  ;;  %v31_v14 = vld [vmem:[%s246_s0 + $0xb8] sm:$0xff]  ;;  %v32_v16 = vld [vmem:[%s246_s0 + $0xc0] sm:$0xff] }
   0x6   :  { %73 = vxpose.xlu1.b32.cont [2/16] (narrow) %v25_v2, 32  ;;  %v14_v13 = vld [vmem:[%s246_s0 + $0x30] sm:$0xff]  ;;  %v15_v15 = vld [vmem:[%s246_s0 + $0x38] sm:$0xff]  ;;  %v16_v17 = vld [vmem:[%s246_s0 + $0x40] sm:$0xff] }
   0x7   :  { %41 = vxpose.xlu0.b32.cont [2/16] (narrow) %v9_v3, 32  ;;  %v33_v18 = vld [vmem:[%s246_s0 + $0xc8] sm:$0xff]  ;;  %v34_v20 = vld [vmem:[%s246_s0 + $0xd0] sm:$0xff]  ;;  %v35_v22 = vld [vmem:[%s246_s0 + $0xd8] sm:$0xff] }
   0x8   :  { %v17_v19 = vld [vmem:[%s246_s0 + $0x48] sm:$0xff]  ;;  %v18_v21 = vld [vmem:[%s246_s0 + $0x50] sm:$0xff]  ;;  %v19_v23 = vld [vmem:[%s246_s0 + $0x58] sm:$0xff] }
   0x9   :  { %v36_v24 = vld [vmem:[%s246_s0 + $0xe0] sm:$0xff]  ;;  %v37_v26 = vld [vmem:[%s246_s0 + $0xe8] sm:$0xff]  ;;  %v38_v28 = vld [vmem:[%s246_s0 + $0xf0] sm:$0xff] }
   0xa   :  { %74 = vxpose.xlu1.b32.cont [3/16] (narrow) %v26_v4, 32  ;;  %v20_v25 = vld [vmem:[%s246_s0 + $0x60] sm:$0xff]  ;;  %v21_v27 = vld [vmem:[%s246_s0 + $0x68] sm:$0xff]  ;;  %v22_v29 = vld [vmem:[%s246_s0 + $0x70] sm:$0xff] }
   0xb   :  { %42 = vxpose.xlu0.b32.cont [3/16] (narrow) %v10_v5, 32  ;;  %v39_v30 = vld [vmem:[%s246_s0 + $0xf8] sm:$0xff] }
   0xc   :  { %v23_v31 = vld [vmem:[%s246_s0 + $0x78] sm:$0xff] }
   0xe   :  { %75 = vxpose.xlu1.b32.cont [4/16] (narrow) %v27_v6, 32 }
   0xf   :  { %43 = vxpose.xlu0.b32.cont [4/16] (narrow) %v11_v7, 32 }
  0x12   :  { %76 = vxpose.xlu1.b32.cont [5/16] (narrow) %v28_v8, 32 }
  0x13   :  { %44 = vxpose.xlu0.b32.cont [5/16] (narrow) %v12_v9, 32 }
  0x16   :  { %77 = vxpose.xlu1.b32.cont [6/16] (narrow) %v29_v10, 32 }
  0x17   :  { %45 = vxpose.xlu0.b32.cont [6/16] (narrow) %v13_v11, 32 }
  0x1a   :  { %78 = vxpose.xlu1.b32.cont [7/16] (narrow) %v30_v12, 32 }
  0x1b   :  { %46 = vxpose.xlu0.b32.cont [7/16] (narrow) %v14_v13, 32 }
  0x1e   :  { %79 = vxpose.xlu1.b32.cont [8/16] (narrow) %v31_v14, 32 }
  0x1f   :  { %47 = vxpose.xlu0.b32.cont [8/16] (narrow) %v15_v15, 32 }
  0x22   :  { %80 = vxpose.xlu1.b32.cont [9/16] (narrow) %v32_v16, 32 }
  0x23   :  { %48 = vxpose.xlu0.b32.cont [9/16] (narrow) %v16_v17, 32 }
  0x26   :  { %81 = vxpose.xlu1.b32.cont [10/16] (narrow) %v33_v18, 32 }
  0x27   :  { %49 = vxpose.xlu0.b32.cont [10/16] (narrow) %v17_v19, 32 }
  0x2a   :  { %82 = vxpose.xlu1.b32.cont [11/16] (narrow) %v34_v20, 32 }
  0x2b   :  { %50 = vxpose.xlu0.b32.cont [11/16] (narrow) %v18_v21, 32 }
  0x2e   :  { %83 = vxpose.xlu1.b32.cont [12/16] (narrow) %v35_v22, 32 }
  0x2f   :  { %51 = vxpose.xlu0.b32.cont [12/16] (narrow) %v19_v23, 32 }
  0x32   :  { %84 = vxpose.xlu1.b32.cont [13/16] (narrow) %v36_v24, 32 }
  0x33   :  { %52 = vxpose.xlu0.b32.cont [13/16] (narrow) %v20_v25, 32 }
  0x36   :  { %85 = vxpose.xlu1.b32.cont [14/16] (narrow) %v37_v26, 32 }
  0x37   :  { %53 = vxpose.xlu0.b32.cont [14/16] (narrow) %v21_v27, 32 }
  0x3a   :  { %86 = vxpose.xlu1.b32.cont [15/16] (narrow) %v38_v28, 32 }
  0x3b   :  { %54 = vxpose.xlu0.b32.cont [15/16] (narrow) %v22_v29, 32 }
  0x3e   :  { %87 = vxpose.xlu1.b32.end [16/16] (narrow) %v39_v30, 32 }
  0x3f   :  { %55 = vxpose.xlu0.b32.end [16/16] (narrow) %v23_v31, 32 }
  0x82   :  { %v88_v32 = vpop.trf.xlu1 }
  0x83   :  { %v56_v33 = vpop.trf.xlu0  ;;  %108 = vst [vmem:[%s247_s1 + $0x20] sm:$0xff] %v88_v32 }
  0x84   :  { %104 = vst [vmem:[%s247_s1] sm:$0xff] %v56_v33 }
  0x86   :  { %v89_v34 = vpop.trf.xlu1 }
  0x87   :  { %v57_v35 = vpop.trf.xlu0  ;;  %109 = vst [vmem:[%s247_s1 + $0x28] sm:$0xff] %v89_v34 }
  0x88   :  { %105 = vst [vmem:[%s247_s1 + $0x8] sm:$0xff] %v57_v35 }
  0x8a   :  { %v90_v36 = vpop.trf.xlu1 }
  0x8b   :  { %v58_v37 = vpop.trf.xlu0  ;;  %110 = vst [vmem:[%s247_s1 + $0x30] sm:$0xff] %v90_v36 }
  0x8c   :  { %106 = vst [vmem:[%s247_s1 + $0x10] sm:$0xff] %v58_v37 }
  0x8e   :  { %v91_v38 = vpop.trf.xlu1 }
  0x8f   :  { %v59_v39 = vpop.trf.xlu0  ;;  %111 = vst [vmem:[%s247_s1 + $0x38] sm:$0xff] %v91_v38 }
  0x90   :  { %107 = vst [vmem:[%s247_s1 + $0x18] sm:$0xff] %v59_v39 }

</bundles_post_ra>
